<compile_context>
chip_gen: v6e
topology: v6e:2x2x1
jax: 0.10.0
libtpu: 0.0.40
codegen_flags: <defaults>
</compile_context>

<pallas_src>
import functools

import jax
import jax.numpy as jnp
from jax.experimental import pallas as pl
from jax.experimental.pallas import tpu as pltpu

LANE = 128


def _round_up(x, m):
    return (x + m - 1) // m * m


def _actor_kernel(obs_ref, w1_ref, b1_ref, w2_ref, b2_ref, w3_ref, b3_ref,
                  out_ref, *, action_dim, log_std_min, log_std_max):
    # Layer 1: bf16 MXU matmul, f32 accumulate, bias + ReLU in f32.
    h = jnp.dot(obs_ref[...], w1_ref[...],
                preferred_element_type=jnp.float32) + b1_ref[...]
    h = jnp.maximum(h, 0.0).astype(jnp.bfloat16)

    # Layer 2 (hidden -> hidden).
    h = jnp.dot(h, w2_ref[...],
                preferred_element_type=jnp.float32) + b2_ref[...]
    h = jnp.maximum(h, 0.0).astype(jnp.bfloat16)

    # Single merged output head (128 lanes):
    #   lanes [0:a)   -> mu
    #   lanes [a:2a)  -> log_std (pre-squash)
    #   lanes [2a:3a) -> mu duplicate (so tanh(head) already holds dist.mean there)
    head = jnp.dot(h, w3_ref[...],
                   preferred_element_type=jnp.float32) + b3_ref[...]

    a = action_dim
    t = jnp.tanh(head)                                   # tanh(mu) AND tanh(log_std)
    ls = log_std_min + 0.5 * (log_std_max - log_std_min) * (t + 1.0)
    std = jnp.exp(ls)                                    # valid at lanes [a:2a)

    lane = jax.lax.broadcasted_iota(jnp.int32, head.shape, 1)
    out = jnp.where(lane < a, head,                      # mu
          jnp.where(lane < 2 * a, std,                   # std
          jnp.where(lane < 3 * a, t, 0.0)))              # tanh(mu) == dist.mean
    out_ref[...] = out


def init_actor_params(key, obs_dim, hidden_dim, action_dim, hidden_depth=2):
    """Mirrors weight_init: orthogonal weights, zero bias.

    Weights stored pre-transposed as [in_dim, out_dim] (PyTorch stores [out, in]).
    """
    assert hidden_depth == 2, "this script builds the hidden_depth=2 variant"
    k1, k2, k3 = jax.random.split(key, 3)
    orth = jax.nn.initializers.orthogonal()
    w1 = orth(k1, (hidden_dim, obs_dim), jnp.float32).T
    w2 = orth(k2, (hidden_dim, hidden_dim), jnp.float32).T
    w3 = orth(k3, (2 * action_dim, hidden_dim), jnp.float32).T
    b1 = jnp.zeros((1, hidden_dim), jnp.float32)
    b2 = jnp.zeros((1, hidden_dim), jnp.float32)
    b3 = jnp.zeros((1, 2 * action_dim), jnp.float32)
    return (w1, b1, w2, b2, w3, b3)


def prepare_kernel_params(params, action_dim):
    """One-time layout prep.

    Builds a single merged 128-lane output head:
      cols [0:a)   = W_mu,      cols [a:2a)  = W_logstd,
      cols [2a:3a) = W_mu again (duplicate -> no in-kernel roll),
    zero elsewhere. Matmul weights cast to bf16; biases stay f32.
    """
    w1, b1, w2, b2, w3, b3 = params
    hidden_dim = w3.shape[0]
    a = action_dim
    assert 3 * a <= LANE, "packed single-128-lane output requires 3*action_dim <= 128"

    w_mu, w_ls = w3[:, :a], w3[:, a:]
    b_mu, b_ls = b3[:, :a], b3[:, a:]
    w3p = jnp.zeros((hidden_dim, LANE), jnp.float32)
    w3p = w3p.at[:, 0:a].set(w_mu).at[:, a:2 * a].set(w_ls).at[:, 2 * a:3 * a].set(w_mu)
    b3p = jnp.zeros((1, LANE), jnp.float32)
    b3p = b3p.at[:, 0:a].set(b_mu).at[:, a:2 * a].set(b_ls).at[:, 2 * a:3 * a].set(b_mu)

    return (w1.astype(jnp.bfloat16), b1.astype(jnp.float32),
            w2.astype(jnp.bfloat16), b2.astype(jnp.float32),
            w3p.astype(jnp.bfloat16), b3p.astype(jnp.float32))


def diag_gaussian_actor_forward(obs, kernel_params, log_std_bounds, action_dim,
                                *, tb=None, min_grid_steps=1):
    """Fused actor forward. Returns (mu, std, tanh(mu)) each [B, action_dim] f32.

    min_grid_steps: 1 on single-TC chips (v5e/v6e: fewest grid steps wins),
                    2 on v7x so the batch-parallel grid feeds both TensorCores.
    """
    w1, b1, w2, b2, w3p, b3p = kernel_params
    B, obs_dim = obs.shape
    log_std_min, log_std_max = log_std_bounds

    # Batch tile: one big tile covering the whole batch (up to 1024 rows, a
    # multiple of 16 for bf16 sublane packing). Grid-step overhead (~0.35 us/step)
    # dominates at these shapes, so fewer/bigger tiles is the main lever.
    if tb is None:
        tb = _round_up(pl.cdiv(B, max(1, min_grid_steps)), 16)
        tb = min(tb, 1024)
    tb = max(16, _round_up(tb, 16))
    b_pad = _round_up(B, tb)
    # VMEM note (v7x, 32 MiB scoped default): double-buffered tiles are
    # tb*(obs_dim*2 + 128*4)*2 bytes -- far below the limit for tb <= 1024.

    # Fold batch padding into the bf16 cast (single pad op, no zeros+set round trip).
    obs_b = obs.astype(jnp.bfloat16)
    if b_pad != B:
        obs_b = jnp.pad(obs_b, ((0, b_pad - B), (0, 0)))

    kernel = functools.partial(
        _actor_kernel,
        action_dim=action_dim,
        log_std_min=float(log_std_min),
        log_std_max=float(log_std_max),
    )

    def _const_spec(shape):
        return pl.BlockSpec(shape, lambda i: tuple(0 for _ in shape))

    in_specs = [
        pl.BlockSpec((tb, obs_dim), lambda i: (i, 0)),   # obs tiles over batch
        _const_spec(w1.shape), _const_spec(b1.shape),    # weights stay VMEM-resident
        _const_spec(w2.shape), _const_spec(b2.shape),
        _const_spec(w3p.shape), _const_spec(b3p.shape),
    ]
    out_specs = pl.BlockSpec((tb, LANE), lambda i: (i, 0))

    packed = pl.pallas_call(
        kernel,
        out_shape=jax.ShapeDtypeStruct((b_pad, LANE), jnp.float32),
        grid=(b_pad // tb,),
        in_specs=in_specs,
        out_specs=out_specs,
        compiler_params=pltpu.CompilerParams(
            dimension_semantics=("parallel",)),
    )(obs_b, w1, b1, w2, b2, w3p, b3p)

    a = action_dim
    mu = packed[:B, 0:a]
    std = packed[:B, a:2 * a]
    mean = packed[:B, 2 * a:3 * a]
    return mu, std, mean


def _reference_forward(obs, params, log_std_bounds, *, matmul_dtype=jnp.float32):
    """Plain-JAX reference (optionally with bf16 matmul path to match the kernel)."""
    w1, b1, w2, b2, w3, b3 = params

    def lin(x, w, b):
        return jnp.dot(x.astype(matmul_dtype), w.astype(matmul_dtype),
                       preferred_element_type=jnp.float32) + b

    h = jnp.maximum(lin(obs, w1, b1), 0.0)
    h = jnp.maximum(lin(h, w2, b2), 0.0)
    out = lin(h, w3, b3)
    a = w3.shape[1] // 2
    mu, log_std = out[:, :a], out[:, a:]
    log_std = jnp.tanh(log_std)
    lo, hi = log_std_bounds
    log_std = lo + 0.5 * (hi - lo) * (log_std + 1.0)
    return mu, jnp.exp(log_std), jnp.tanh(mu)


def _check(obs, params, kparams, config, **fwd_kwargs):
    mu, std, squashed_mean = diag_gaussian_actor_forward(
        obs, kparams, config["log_std_bounds"], config["action_dim"], **fwd_kwargs)
    jax.block_until_ready((mu, std, squashed_mean))

    # Tight check against a bf16-matched reference.
    mu_r, std_r, mean_r = _reference_forward(
        obs, params, config["log_std_bounds"], matmul_dtype=jnp.bfloat16)
    assert jnp.allclose(mu, mu_r, atol=1e-3, rtol=1e-3)
    assert jnp.allclose(std, std_r, atol=1e-3, rtol=1e-3)
    assert jnp.allclose(squashed_mean, mean_r, atol=1e-3, rtol=1e-3)

    # Loose sanity check against the pure-f32 reference (bf16 matmul rounding).
    mu_f, std_f, mean_f = _reference_forward(
        obs, params, config["log_std_bounds"], matmul_dtype=jnp.float32)
    assert jnp.allclose(mu, mu_f, atol=1e-1, rtol=1e-1)
    assert jnp.allclose(std, std_f, atol=1e-1, rtol=1e-1)
    assert jnp.allclose(squashed_mean, mean_f, atol=1e-1, rtol=1e-1)


if __name__ == "__main__":
    config = dict(obs_dim=32, action_dim=4, hidden_dim=32, hidden_depth=2,
                  log_std_bounds=(-5.0, 2.0))

    key = jax.random.PRNGKey(0)
    k_obs, k_obs2, k_params = jax.random.split(key, 3)
    params = init_actor_params(k_params, config["obs_dim"], config["hidden_dim"],
                               config["action_dim"], config["hidden_depth"])
    kparams = prepare_kernel_params(params, config["action_dim"])

    # Case 1: B=32 -> single grid step covering the whole batch (v5e/v6e style).
    obs = jax.random.normal(k_obs, (32, config["obs_dim"]), jnp.float32)
    _check(obs, params, kparams, config)

    # Case 2: ragged B=50 with min_grid_steps=2 (v7x style: both TCs fed) +
    # exercises the batch-padding path.
    obs2 = jax.random.normal(k_obs2, (50, config["obs_dim"]), jnp.float32)
    _check(obs2, params, kparams, config, min_grid_steps=2)

    # TODO(synk): SquashedNormal.rsample()/log_prob() are sampling-time ops built
    # on (mu, std); they stay outside this deterministic forward kernel.
    print("KERNEL_OK")
</pallas_src>

<mosaic_0001>
module attributes {stable_mosaic.version = 11 : i64} {
  func.func @_actor_kernel(%arg0: i32, %arg1: memref<32x32xbf16, #tpu.memory_space<vmem>>, %arg2: memref<32x32xbf16, #tpu.memory_space<vmem>>, %arg3: memref<1x32xf32, #tpu.memory_space<vmem>>, %arg4: memref<32x32xbf16, #tpu.memory_space<vmem>>, %arg5: memref<1x32xf32, #tpu.memory_space<vmem>>, %arg6: memref<32x128xbf16, #tpu.memory_space<vmem>>, %arg7: memref<1x128xf32, #tpu.memory_space<vmem>>, %arg8: memref<32x128xf32, #tpu.memory_space<vmem>>) attributes {dimension_semantics = [#tpu.dimension_semantics<parallel>], iteration_bounds = array<i64: 1>, scalar_prefetch = 0 : i64, scratch_operands = 0 : i64, tpu.core_type = #tpu.core_type<tc>, window_params = [{transform_indices = @transform_0, window_bounds = array<i64: 32, 32>}, {pipeline_mode = #tpu.pipeline_mode<synchronous>, transform_indices = @transform_1, window_bounds = array<i64: 32, 32>}, {pipeline_mode = #tpu.pipeline_mode<synchronous>, transform_indices = @transform_2, window_bounds = array<i64: 1, 32>}, {pipeline_mode = #tpu.pipeline_mode<synchronous>, transform_indices = @transform_3, window_bounds = array<i64: 32, 32>}, {pipeline_mode = #tpu.pipeline_mode<synchronous>, transform_indices = @transform_4, window_bounds = array<i64: 1, 32>}, {pipeline_mode = #tpu.pipeline_mode<synchronous>, transform_indices = @transform_5, window_bounds = array<i64: 32, 128>}, {pipeline_mode = #tpu.pipeline_mode<synchronous>, transform_indices = @transform_6, window_bounds = array<i64: 1, 128>}, {transform_indices = @transform_7, window_bounds = array<i64: 32, 128>}]} {
    %c0 = arith.constant 0 : index
    %c0_0 = arith.constant 0 : index
    %0 = vector.load %arg1[%c0, %c0_0] : memref<32x32xbf16, #tpu.memory_space<vmem>>, vector<32x32xbf16>
    %c0_1 = arith.constant 0 : index
    %c0_2 = arith.constant 0 : index
    %1 = vector.load %arg2[%c0_1, %c0_2] : memref<32x32xbf16, #tpu.memory_space<vmem>>, vector<32x32xbf16>
    %cst = arith.constant dense<0.000000e+00> : vector<32x32xf32>
    %2 = tpu.matmul %0, %1, %cst {dimension_numbers = #tpu.dot_dimension_numbers<[1], [0], [0], [1], [0, 0, 1, 1], [], []>} : vector<32x32xbf16>, vector<32x32xbf16>, vector<32x32xf32> -> vector<32x32xf32>
    %c0_3 = arith.constant 0 : index
    %c0_4 = arith.constant 0 : index
    %3 = vector.load %arg3[%c0_3, %c0_4] : memref<1x32xf32, #tpu.memory_space<vmem>>, vector<1x32xf32>
    %4 = vector.broadcast %3 : vector<1x32xf32> to vector<32x32xf32>
    %5 = arith.addf %2, %4 : vector<32x32xf32>
    %cst_5 = arith.constant 0.000000e+00 : f32
    %6 = vector.broadcast %cst_5 : f32 to vector<32x32xf32>
    %7 = arith.maximumf %5, %6 : vector<32x32xf32>
    %8 = arith.truncf %7 : vector<32x32xf32> to vector<32x32xbf16>
    %c0_6 = arith.constant 0 : index
    %c0_7 = arith.constant 0 : index
    %9 = vector.load %arg4[%c0_6, %c0_7] : memref<32x32xbf16, #tpu.memory_space<vmem>>, vector<32x32xbf16>
    %cst_8 = arith.constant dense<0.000000e+00> : vector<32x32xf32>
    %10 = tpu.matmul %8, %9, %cst_8 {dimension_numbers = #tpu.dot_dimension_numbers<[1], [0], [0], [1], [0, 0, 1, 1], [], []>} : vector<32x32xbf16>, vector<32x32xbf16>, vector<32x32xf32> -> vector<32x32xf32>
    %c0_9 = arith.constant 0 : index
    %c0_10 = arith.constant 0 : index
    %11 = vector.load %arg5[%c0_9, %c0_10] : memref<1x32xf32, #tpu.memory_space<vmem>>, vector<1x32xf32>
    %12 = vector.broadcast %11 : vector<1x32xf32> to vector<32x32xf32>
    %13 = arith.addf %10, %12 : vector<32x32xf32>
    %cst_11 = arith.constant 0.000000e+00 : f32
    %14 = vector.broadcast %cst_11 : f32 to vector<32x32xf32>
    %15 = arith.maximumf %13, %14 : vector<32x32xf32>
    %16 = arith.truncf %15 : vector<32x32xf32> to vector<32x32xbf16>
    %c0_12 = arith.constant 0 : index
    %c0_13 = arith.constant 0 : index
    %17 = vector.load %arg6[%c0_12, %c0_13] : memref<32x128xbf16, #tpu.memory_space<vmem>>, vector<32x128xbf16>
    %cst_14 = arith.constant dense<0.000000e+00> : vector<32x128xf32>
    %18 = tpu.matmul %16, %17, %cst_14 {dimension_numbers = #tpu.dot_dimension_numbers<[1], [0], [0], [1], [0, 0, 1, 1], [], []>} : vector<32x32xbf16>, vector<32x128xbf16>, vector<32x128xf32> -> vector<32x128xf32>
    %c0_15 = arith.constant 0 : index
    %c0_16 = arith.constant 0 : index
    %19 = vector.load %arg7[%c0_15, %c0_16] : memref<1x128xf32, #tpu.memory_space<vmem>>, vector<1x128xf32>
    %20 = vector.broadcast %19 : vector<1x128xf32> to vector<32x128xf32>
    %21 = arith.addf %18, %20 : vector<32x128xf32>
    %22 = math.tanh %21 : vector<32x128xf32>
    %cst_17 = arith.constant 1.000000e+00 : f32
    %23 = vector.broadcast %cst_17 : f32 to vector<32x128xf32>
    %24 = arith.addf %22, %23 : vector<32x128xf32>
    %cst_18 = arith.constant 3.500000e+00 : f32
    %25 = vector.broadcast %cst_18 : f32 to vector<32x128xf32>
    %26 = arith.mulf %25, %24 : vector<32x128xf32>
    %cst_19 = arith.constant -5.000000e+00 : f32
    %27 = vector.broadcast %cst_19 : f32 to vector<32x128xf32>
    %28 = arith.addf %27, %26 : vector<32x128xf32>
    %29 = math.exp %28 : vector<32x128xf32>
    %30 = tpu.iota {dimensions = array<i32: 1>} : vector<32x128xi32>
    %c4_i32 = arith.constant 4 : i32
    %31 = vector.broadcast %c4_i32 : i32 to vector<32x128xi32>
    %32 = arith.cmpi slt, %30, %31 : vector<32x128xi32>
    %c8_i32 = arith.constant 8 : i32
    %33 = vector.broadcast %c8_i32 : i32 to vector<32x128xi32>
    %34 = arith.cmpi slt, %30, %33 : vector<32x128xi32>
    %c12_i32 = arith.constant 12 : i32
    %35 = vector.broadcast %c12_i32 : i32 to vector<32x128xi32>
    %36 = arith.cmpi slt, %30, %35 : vector<32x128xi32>
    %cst_20 = arith.constant 0.000000e+00 : f32
    %37 = vector.broadcast %cst_20 : f32 to vector<32x128xf32>
    %38 = arith.select %36, %22, %37 : vector<32x128xi1>, vector<32x128xf32>
    %39 = arith.select %34, %29, %38 : vector<32x128xi1>, vector<32x128xf32>
    %40 = arith.select %32, %21, %39 : vector<32x128xi1>, vector<32x128xf32>
    %c0_21 = arith.constant 0 : index
    %c0_22 = arith.constant 0 : index
    %41 = vector.load %arg8[%c0_21, %c0_22] : memref<32x128xf32, #tpu.memory_space<vmem>>, vector<32x128xf32>
    tpu.vector_store %arg8[%c0_21, %c0_22], %40 {strides = array<i32>} : memref<32x128xf32, #tpu.memory_space<vmem>>, vector<32x128xf32>,
    return
  }
  func.func @transform_0(%arg0: i32) -> (i32, i32) {
    %c0_i32 = arith.constant 0 : i32
    %c0_i32_0 = arith.constant 0 : i32
    return %arg0, %c0_i32 : i32, i32
  }
  func.func @transform_1(%arg0: i32) -> (i32, i32) {
    %c0_i32 = arith.constant 0 : i32
    %c0_i32_0 = arith.constant 0 : i32
    %c0_i32_1 = arith.constant 0 : i32
    return %c0_i32, %c0_i32_0 : i32, i32
  }
  func.func @transform_2(%arg0: i32) -> (i32, i32) {
    %c0_i32 = arith.constant 0 : i32
    %c0_i32_0 = arith.constant 0 : i32
    %c0_i32_1 = arith.constant 0 : i32
    return %c0_i32, %c0_i32_0 : i32, i32
  }
  func.func @transform_3(%arg0: i32) -> (i32, i32) {
    %c0_i32 = arith.constant 0 : i32
    %c0_i32_0 = arith.constant 0 : i32
    %c0_i32_1 = arith.constant 0 : i32
    return %c0_i32, %c0_i32_0 : i32, i32
  }
  func.func @transform_4(%arg0: i32) -> (i32, i32) {
    %c0_i32 = arith.constant 0 : i32
    %c0_i32_0 = arith.constant 0 : i32
    %c0_i32_1 = arith.constant 0 : i32
    return %c0_i32, %c0_i32_0 : i32, i32
  }
  func.func @transform_5(%arg0: i32) -> (i32, i32) {
    %c0_i32 = arith.constant 0 : i32
    %c0_i32_0 = arith.constant 0 : i32
    %c0_i32_1 = arith.constant 0 : i32
    return %c0_i32, %c0_i32_0 : i32, i32
  }
  func.func @transform_6(%arg0: i32) -> (i32, i32) {
    %c0_i32 = arith.constant 0 : i32
    %c0_i32_0 = arith.constant 0 : i32
    %c0_i32_1 = arith.constant 0 : i32
    return %c0_i32, %c0_i32_0 : i32, i32
  }
  func.func @transform_7(%arg0: i32) -> (i32, i32) {
    %c0_i32 = arith.constant 0 : i32
    %c0_i32_0 = arith.constant 0 : i32
    return %arg0, %c0_i32 : i32, i32
  }
}

</mosaic_0001>

<bundles_post_ra>
// kernel: tpu_custom_call.1
= control target key start
LH: loop header
LB: loop body
LE: loop exit
PB: predicated region body
PF: predicated region fallthrough
CT: control target
= control target key end

     0   :  { %12 = vsyncpa [#allocation3], 0  ;;  %s705_s0 = inlined_call_operand.hbm [shape: bf16[32,32], index: 0, kind: input, shape index: {}]   ;;  %s706_s1 = inlined_call_operand.hbm [shape: bf16[32,32], index: 1, kind: input, shape index: {}]   ;;  %s707_s2 = inlined_call_operand.vmem [shape: f32[1,32], index: 2, kind: input, shape index: {}]   ;;  %s708_s3 = inlined_call_operand.hbm [shape: bf16[32,32], index: 3, kind: input, shape index: {}]   ;;  %s709_s4 = inlined_call_operand.vmem [shape: f32[1,32], index: 4, kind: input, shape index: {}]   ;;  %s710_s5 = inlined_call_operand.hbm [shape: bf16[32,128], index: 5, kind: input, shape index: {}]   ;;  %s711_s6 = inlined_call_operand.vmem [shape: f32[1,128], index: 6, kind: input, shape index: {}]   ;;  %s712_s7 = inlined_call_operand.hbm [shape: f32[32,128], index: 7, kind: output, shape index: {}]  }
   0x1   :  { %13 = vsyncpa [#allocation6], 0 }
   0x2   :  { %14 = vsyncpa [#allocation9], 0 }
   0x3   :  { %15 = vsyncpa [#allocation4], 0  ;;  %s602_s24 = smov [#allocation5]   ;;  %s603_s26 = smov [#allocation2]  }
   0x4   :  { %s33_s25 = sshll.u32 %s602_s24, 4  ;;  %s21_s27 = sshll.u32 %s603_s26, 4  ;;  %s34_s25 = int_to_ptr.vmem [resolvable:$true] %s33_s25  ;;  %s22_s27 = int_to_ptr.vmem [resolvable:$true] %s21_s27 }
   0x5   :  { %s502_s28 = scalar_lea.vmem %s34_s25, 256  ;;  %p507_p1 = scmp.lt.s32.totalorder %s34_s25, %s34_s25 }
   0x6   :  { %p503_p0 = scmp.ne.s32.totalorder %s34_s25, %s502_s28  ;;  %p508_p2 = scmp.lt.s32.totalorder %s502_s28, %s502_s28 }
   0x8   :  { %p509_p3 = por %p508_p2, %p507_p1 }
   0xa   :  { %p510_p4 = pnand %p509_p3, %p503_p0 }
   0xc   :  { %513 = shalt.err (!%p510_p4)
}
   0xd   :  { %s604_s29 = smov 64   ;;  %s605_s30 = smov 4  }
   0xe   :  { %39 = dma.hbm_to_vmem [thread:$0]  %s706_s1, 256, %s34_s25, [#allocation6], %s604_s29, %s604_s29, %s605_s30  }
   0xf   :  { %s522_s10 = scalar_lea.vmem %s22_s27, 256  ;;  %p527_p6 = scmp.lt.s32.totalorder %s22_s27, %s22_s27 }
  0x10   :  { %p523_p5 = scmp.ne.s32.totalorder %s22_s27, %s522_s10  ;;  %p528_p7 = scmp.lt.s32.totalorder %s522_s10, %s522_s10 }
  0x12   :  { %p529_p8 = por %p528_p7, %p527_p6 }
  0x14   :  { %p530_p9 = pnand %p529_p8, %p523_p5 }
  0x16   :  { %533 = shalt.err (!%p530_p9)
}
  0x17   :  { %27 = dma.hbm_to_vmem [thread:$0]  %s705_s0, 256, %s22_s27, [#allocation3], %s604_s29, %s604_s29, %s605_s30  }
  0x18   :  { %s606_s13 = smov [#allocation7]   ;;  %s607_s15 = smov [#allocation8]  }
  0x19   :  { %s47_s14 = sshll.u32 %s606_s13, 4  ;;  %s61_s16 = sshll.u32 %s607_s15, 4  ;;  %s48_s14 = int_to_ptr.vmem [resolvable:$true] %s47_s14  ;;  %s62_s16 = int_to_ptr.vmem [resolvable:$true] %s61_s16 }
  0x1a   :  { %s542_s1 = scalar_lea.vmem %s48_s14, 256  ;;  %p547_p11 = scmp.lt.s32.totalorder %s48_s14, %s48_s14 }
  0x1b   :  { %p543_p10 = scmp.ne.s32.totalorder %s48_s14, %s542_s1  ;;  %p548_p12 = scmp.lt.s32.totalorder %s542_s1, %s542_s1 }
  0x1d   :  { %p549_p13 = por %p548_p12, %p547_p11 }
  0x1f   :  { %p550_p0 = pnand %p549_p13, %p543_p10 }
  0x21   :  { %553 = shalt.err (!%p550_p0)
}
  0x22   :  { %53 = dma.hbm_to_vmem [thread:$0]  %s708_s3, 256, %s48_s14, [#allocation6], %s604_s29, %s604_s29, %s605_s30  }
  0x23   :  { %s562_s0 = scalar_lea.vmem %s62_s16, 256  ;;  %p567_p2 = scmp.lt.s32.totalorder %s62_s16, %s62_s16 }
  0x24   :  { %p563_p1 = scmp.ne.s32.totalorder %s62_s16, %s562_s0  ;;  %p568_p3 = scmp.lt.s32.totalorder %s562_s0, %s562_s0 }
  0x26   :  { %p569_p4 = por %p568_p3, %p567_p2 }
  0x28   :  { %p570_p5 = pnand %p569_p4, %p563_p1 }
  0x2a   :  { %573 = shalt.err (!%p570_p5)
}
  0x2b   :  { %67 = dma.hbm_to_vmem [thread:$0]  %s710_s5, 256, %s62_s16, [#allocation9], %s604_s29, %s604_s29, %s605_s30  }
  0x2c   :  { %594 = dma.done.wait [#allocation3], 256  }
  0x2d   :  { %595 = vsyncadd [#allocation3], 4294967040 }
  0x2e   :  { %596 = dma.done.wait [#allocation6], 512  }
  0x2f   :  { %597 = vsyncadd [#allocation6], 4294966784 }
  0x30   :  { %598 = dma.done.wait [#allocation9], 256  }
  0x31   :  { %599 = vsyncadd [#allocation9], 4294967040  ;;  %v470_v0 = vld [vmem:[#allocation5 + $0x8] sm:$0xff]   ;;  %v471_v1 = vld [vmem:[#allocation5] sm:$0xff]   ;;  %vm120_vm0 = vcmask 261120  }
  0x32   :  { %437 = vmatprep.subr.bf16.mxu0 %v470_v0  ;;  %v472_v2 = vld [vmem:[#allocation2] sm:$0xff]   ;;  %v473_v3 = vld [vmem:[#allocation2 + $0x8] sm:$0xff]   ;;  %v476_v21 = vld [vmem:[#allocation8 + $0x8] sm:$0xff]  }
  0x33   :  { %438 = vmatpush3.bf16.msra.mxu0 %v470_v0  ;;  %441 = vmatprep.mubr.msk.bf16.mxu0 %vm120_vm0, %v472_v2  ;;  %v474_v4 = vld [vmem:[#allocation7 + $0x8] sm:$0xff]   ;;  %v475_v5 = vld [vmem:[#allocation7] sm:$0xff]   ;;  %v477_v22 = vld [vmem:[#allocation8] sm:$0xff]   ;;  %v368_v0 = vlaneseq }
  0x34   :  { %439 = vmatprep.subr.bf16.mxu0 %v471_v1  ;;  %445 = vmatprep.subr.bf16.mxu1 %v474_v4  ;;  %v408_v8 = vld [vmem:[%s707_s2] ss:$0 sm:$0xff] }
  0x35   :  { %446 = vmatpush3.bf16.msra.mxu1 %v474_v4  ;;  %v415_v25 = vld [vmem:[%s709_s4] ss:$0 sm:$0xff]  ;;  %v369_v4 = vand.u32 127, %v368_v0  ;;  %s608_s4 = smov [#allocation10]  }
  0x36   :  { %447 = vmatprep.subr.bf16.mxu1 %v475_v5  ;;  %v420_v38 = vld [vmem:[%s711_s6] ss:$0 sm:$0xff]  ;;  %s394_s6 = sshll.u32 %s608_s4, 4  ;;  %s395_s6 = int_to_ptr.vmem [resolvable:$true] %s394_s6 }
  0x37   :  { %440 = vmatpush3.bf16.msra.mxu0 %v471_v1  ;;  %vm372_vm1 = vcmp.lt.s32.totalorder %v369_v4, 12  ;;  %vm371_vm2 = vcmp.lt.s32.totalorder %v369_v4, 8  ;;  %vm370_vm3 = vcmp.lt.s32.totalorder %v369_v4, 4  ;;  %s574_s24 = scalar_lea.vmem %s395_s6, 512  ;;  %p579_p7 = scmp.lt.s32.totalorder %s395_s6, %s395_s6 }
  0x38   :  { %453 = vmatprep.subr.bf16.mxu0 %v476_v21  ;;  %p575_p6 = scmp.ne.s32.totalorder %s395_s6, %s574_s24  ;;  %p580_p8 = scmp.lt.s32.totalorder %s574_s24, %s574_s24 }
  0x39   :  { %448 = vmatpush3.bf16.msra.mxu1 %v475_v5 }
  0x3a   :  { %442 = vmatmul.mubr.msk.bf16.vlgmr.msra.gmra.mxu0 %vm120_vm0, %v473_v3  ;;  %p581_p9 = por %p580_p8, %p579_p7 }
  0x3b   :  { %454 = vmatpush3.bf16.msra.mxu0 %v476_v21 }
  0x3c   :  { %455 = vmatprep.subr.bf16.mxu0 %v477_v22  ;;  %p582_p10 = pnand %p581_p9, %p575_p6 }
  0x3f   :  { %456 = vmatpush3.bf16.msra.mxu0 %v477_v22 }
  0xfa   :  { %v443_v6 = vpop.f32.mrf.mxu0 }
  0xfb   :  { %v170_v12 = vadd.f32 %v443_v6, %v408_v8 }
  0xfc   :  { %v161_v7 = vpop.f32.mrf.mxu0 }
  0xfd   :  { %v162_v10 = vadd.f32 %v408_v8, %v161_v7  ;;  %v178_v18 = vmax.f32 %v170_v12, 0.0 }
  0xfe   :  { %v444_v9 = vpop.f32.mrf.mxu0 }
  0xff   :  { %v173_v11 = vadd.f32 %v444_v9, %v408_v8  ;;  %v176_v16 = vmax.f32 %v162_v10, 0.0 }
 0x100   :  { %v164_v13 = vpop.f32.mrf.mxu0 }
 0x101   :  { %v165_v14 = vadd.f32 %v408_v8, %v164_v13  ;;  %v179_v15 = vmax.f32 %v173_v11, 0.0 }
 0x103   :  { %v177_v17 = vmax.f32 %v165_v14, 0.0  ;;  %v181_v20 = vpack.c.bf16 %v179_v15, %v178_v18 }
 0x105   :  { %v180_v19 = vpack.c.bf16 %v177_v17, %v176_v16 }
 0x107   :  { %449 = vmatprep.mubr.msk.bf16.mxu1 %vm120_vm0, %v180_v19 }
 0x108   :  { %450 = vmatmul.mubr.msk.bf16.vlgmr.msra.gmra.mxu1 %vm120_vm0, %v181_v20 }
 0x1c8   :  { %v451_v23 = vpop.f32.mrf.mxu1 }
 0x1c9   :  { %v254_v29 = vadd.f32 %v451_v23, %v415_v25 }
 0x1ca   :  { %v245_v24 = vpop.f32.mrf.mxu1 }
 0x1cb   :  { %v246_v27 = vadd.f32 %v415_v25, %v245_v24  ;;  %v262_v35 = vmax.f32 %v254_v29, 0.0 }
 0x1cc   :  { %v452_v26 = vpop.f32.mrf.mxu1 }
 0x1cd   :  { %v257_v28 = vadd.f32 %v452_v26, %v415_v25  ;;  %v260_v33 = vmax.f32 %v246_v27, 0.0 }
 0x1ce   :  { %v248_v30 = vpop.f32.mrf.mxu1 }
 0x1cf   :  { %v249_v31 = vadd.f32 %v415_v25, %v248_v30  ;;  %v263_v32 = vmax.f32 %v257_v28, 0.0 }
 0x1d1   :  { %v261_v34 = vmax.f32 %v249_v31, 0.0  ;;  %v265_v37 = vpack.c.bf16 %v263_v32, %v262_v35 }
 0x1d3   :  { %v264_v36 = vpack.c.bf16 %v261_v34, %v260_v33 }
 0x1d5   :  { %457 = vmatprep.mubr.msk.bf16.mxu0 %vm120_vm0, %v264_v36 }
 0x1d6   :  { %458 = vmatmul.mubr.msk.bf16.vlgmr.msra.gmra.mxu0 %vm120_vm0, %v265_v37 }
 0x296   :  { %v459_v39 = vpop.f32.mrf.mxu0 }
 0x297   :  { %v338_v40 = vadd.f32 %v459_v39, %v420_v38 }
 0x298   :  { %v329_v41 = vpop.f32.mrf.mxu0 }
 0x299   :  { %478 = vtanh.f32 %v338_v40  ;;  %v330_v42 = vadd.f32 %v420_v38, %v329_v41 }
 0x29a   :  { %v460_v43 = vpop.f32.mrf.mxu0 }
 0x29b   :  { %480 = vtanh.f32 %v330_v42  ;;  %v341_v44 = vadd.f32 %v460_v43, %v420_v38 }
 0x29c   :  { %v332_v45 = vpop.f32.mrf.mxu0 }
 0x29d   :  { %482 = vtanh.f32 %v341_v44  ;;  %v333_v46 = vadd.f32 %v420_v38, %v332_v45 }
 0x29f   :  { %484 = vtanh.f32 %v333_v46 }
 0x2a6   :  { %v479_v47 = vpop.eup %478 }
 0x2a7   :  { %v350_v48 = vadd.f32 1.0, %v479_v47  ;;  %v375_v6 = vsel %vm372_vm1, %v479_v47, 0.0 }
 0x2a8   :  { %v481_v49 = vpop.eup %480 }
 0x2a9   :  { %v354_v50 = vmul.f32 3.5, %v350_v48  ;;  %v348_v51 = vadd.f32 1.0, %v481_v49  ;;  %v373_v10 = vsel %vm372_vm1, %v481_v49, 0.0 }
 0x2aa   :  { %v483_v52 = vpop.eup %482 }
 0x2ab   :  { %v358_v53 = vadd.f32 -5.0, %v354_v50  ;;  %v352_v54 = vmul.f32 3.5, %v348_v51  ;;  %v351_v55 = vadd.f32 1.0, %v483_v52  ;;  %v376_v14 = vsel %vm372_vm1, %v483_v52, 0.0 }
 0x2ac   :  { %v485_v56 = vpop.eup %484 }
 0x2ad   :  { %v364_v57 = vmul.f32 1.442695, %v358_v53  ;;  %v356_v58 = vadd.f32 -5.0, %v352_v54  ;;  %v355_v59 = vmul.f32 3.5, %v351_v55  ;;  %v349_v60 = vadd.f32 1.0, %v485_v56 }
 0x2ae   :  { %v374_v18 = vsel %vm372_vm1, %v485_v56, 0.0 }
 0x2af   :  { %486 = vpow2.f32 %v364_v57  ;;  %v360_v61 = vmul.f32 1.442695, %v356_v58  ;;  %v359_v62 = vadd.f32 -5.0, %v355_v59  ;;  %v353_v63 = vmul.f32 3.5, %v349_v60 }
 0x2b1   :  { %488 = vpow2.f32 %v360_v61  ;;  %v366_v1 = vmul.f32 1.442695, %v359_v62  ;;  %v357_v2 = vadd.f32 -5.0, %v353_v63 }
 0x2b3   :  { %490 = vpow2.f32 %v366_v1  ;;  %v362_v3 = vmul.f32 1.442695, %v357_v2 }
 0x2b5   :  { %492 = vpow2.f32 %v362_v3 }
 0x2bc   :  { %v487_v5 = vpop.eup %486 }
 0x2bd   :  { %v379_v7 = vsel %vm371_vm2, %v487_v5, %v375_v6 }
 0x2be   :  { %v489_v8 = vpop.eup %488  ;;  %v383_v9 = vsel %vm370_vm3, %v338_v40, %v379_v7 }
 0x2bf   :  { %387 = vst [vmem:[#allocation10 + $0x10] sm:$0xff] %v383_v9  ;;  %v377_v11 = vsel %vm371_vm2, %v489_v8, %v373_v10 }
 0x2c0   :  { %v491_v12 = vpop.eup %490  ;;  %v381_v13 = vsel %vm370_vm3, %v330_v42, %v377_v11 }
 0x2c1   :  { %385 = vst [vmem:[#allocation10] sm:$0xff] %v381_v13  ;;  %v380_v15 = vsel %vm371_vm2, %v491_v12, %v376_v14 }
 0x2c2   :  { %v493_v16 = vpop.eup %492  ;;  %v384_v17 = vsel %vm370_vm3, %v341_v44, %v380_v15 }
 0x2c3   :  { %388 = vst [vmem:[#allocation10 + $0x18] sm:$0xff] %v384_v17  ;;  %v378_v19 = vsel %vm371_vm2, %v493_v16, %v374_v18 }
 0x2c4   :  { %v382_v20 = vsel %vm370_vm3, %v333_v46, %v378_v19 }
 0x2c5   :  { %386 = vst [vmem:[#allocation10 + $0x8] sm:$0xff] %v382_v20 }
 0x2c6   :  { %585 = shalt.err (!%p582_p10)
}
 0x2c7   :  { %s609_s25 = smov 128   ;;  %s610_s26 = smov 8  }
 0x2c8   :  { %400 = dma.vmem_to_hbm [thread:$0]  %s395_s6, 512, %s712_s7, [#allocation4], %s609_s25, %s609_s25, %s610_s26  }
 0x2c9   :  { %600 = dma.done.wait [#allocation4], 512  }
 0x2ca   :  { %601 = vsyncadd [#allocation4], 4294966784 }
 0x2cb   :  { %404 = vsyncpa [#allocation3], 1 }
 0x2cc   :  { %405 = vsyncpa [#allocation6], 1 }
 0x2cd   :  { %406 = vsyncpa [#allocation9], 1 }
 0x2ce   :  { %407 = vsyncpa [#allocation4], 1 }

</bundles_post_ra>
